<compile_context>
chip_gen: v7x
topology: tpu7x:2x2x1
jax: 0.10.0
libtpu: 0.0.40
codegen_flags: <defaults>
</compile_context>

<pallas_src>
import functools

import jax
import jax.numpy as jnp
import numpy as np
from jax.experimental import pallas as pl
from jax.experimental.pallas import tpu as pltpu

NEG_SLOPE = 0.01  # PyTorch LeakyReLU default
BN_EPS = 1e-5


# ---------------------------------------------------------------------------
# Kernel
# ---------------------------------------------------------------------------
def _resblock_kernel(x_ref, w1_ref, w2_ref, b1_ref, b2_ref, o_ref, *,
                     rows_per_sample):
    """One row-block (whole samples) per grid step.

    x_ref        : (R, L)  f32   packed activations, L = 2*W*C (lane-dense, 128)
                                 lane index = (h%2)*W*C + w*C + c, row = (n, h//2)
    w1_ref/w2_ref: (3L, L) bf16  stacked banded conv matrices [B_up; B_mid; B_dn]
                                 with BN scale folded in and W zero-padding baked in
    b1_ref/b2_ref: (1, L)  f32   folded BN bias, tiled across (h%2, w)
    o_ref        : (R, L)  f32
    """
    R, L = x_ref.shape
    x = x_ref[...]                                               # (R, L) f32

    # Hoisted boundary machinery: built once, reused by both conv layers.
    row = jax.lax.broadcasted_iota(jnp.int32, (R, L), 0)
    top = (row % rows_per_sample) == 0                           # first super-row
    bot = (row % rows_per_sample) == rows_per_sample - 1         # last super-row

    def conv(v, w_ref):
        # Row-shifted views (XLU roll) with zero rows at the per-sample H boundary
        # (VPU mask). The W boundary is handled inside the banded weight matrices.
        v_up = jnp.where(top, 0.0, pltpu.roll(v, shift=1, axis=0))       # sr[r-1]
        v_dn = jnp.where(bot, 0.0, pltpu.roll(v, shift=R - 1, axis=0))   # sr[r+1]
        # Fuse the three dy dots into one K=3L contraction; MXU operands in bf16.
        vcat = jnp.concatenate([v_up, v, v_dn], axis=-1).astype(jnp.bfloat16)
        return jnp.dot(vcat, w_ref[...], preferred_element_type=jnp.float32)

    h = conv(x, w1_ref) + b1_ref[...]
    h = jnp.where(h >= 0, h, NEG_SLOPE * h)

    h = conv(h, w2_ref) + b2_ref[...]
    h = jnp.where(h >= 0, h, NEG_SLOPE * h)

    o_ref[...] = (h + x).astype(o_ref.dtype)                     # residual add


# ---------------------------------------------------------------------------
# One-time parameter packing (hoisted out of the per-call path)
# ---------------------------------------------------------------------------
def _band_matrices(w_oihw, scale, W):
    """Per-dy banded matrices (WC, WC) for a 3x3 'same' conv along W.

    band[dy][win*C + ci, wout*C + co] = w[co, ci, dy, dx] * scale[co],
    win = wout + dx - 1; out-of-range entries dropped == zero padding along W.
    """
    C = w_oihw.shape[0]
    w_t = jnp.transpose(w_oihw, (2, 3, 1, 0)).astype(jnp.float32)   # (dy, dx, ci, co)
    w_t = w_t * scale[None, None, None, :]                          # fold BN scale
    bands = []
    for dy in range(3):
        mat = jnp.zeros((W * C, W * C), jnp.float32)
        for dx in range(3):
            shift = dx - 1
            S = jnp.eye(W, k=-shift, dtype=jnp.float32)   # S[win, wout]=1 iff win==wout+shift
            mat = mat + jnp.kron(S, w_t[dy, dx])
        bands.append(mat)
    return bands                                                     # 3 x (WC, WC)


def _packed_weight(w_oihw, scale, W):
    """Stacked (3*2WC, 2WC) bf16 weight for the lane-folded (2 rows / lane slab) layout."""
    b0, b1, b2 = _band_matrices(w_oihw, scale, W)
    WC = b0.shape[0]
    Z = jnp.zeros((WC, WC), jnp.float32)
    # Block rows = input half (h%2 of the source super-row), cols = output half.
    B_up = jnp.block([[Z, Z], [b0, Z]])      # contribution from super-row r-1
    B_mid = jnp.block([[b1, b0], [b2, b1]])  # contribution from super-row r
    B_dn = jnp.block([[Z, b2], [Z, Z]])      # contribution from super-row r+1
    return jnp.concatenate([B_up, B_mid, B_dn], axis=0).astype(jnp.bfloat16)


def make_resblock_params(w1_oihw, w2_oihw,
                         g1, be1, rm1, rv1, g2, be2, rm2, rv2, *, W):
    """Fold eval-mode BN into the conv weights/bias and build packed band matrices."""
    C = w1_oihw.shape[0]
    L = 2 * W * C
    s1 = (g1 / jnp.sqrt(rv1 + BN_EPS)).astype(jnp.float32)
    s2 = (g2 / jnp.sqrt(rv2 + BN_EPS)).astype(jnp.float32)
    b1 = jnp.tile((be1 - rm1 * s1).astype(jnp.float32), (2 * W,)).reshape(1, L)
    b2 = jnp.tile((be2 - rm2 * s2).astype(jnp.float32), (2 * W,)).reshape(1, L)
    return dict(w1=_packed_weight(w1_oihw, s1, W),
                w2=_packed_weight(w2_oihw, s2, W),
                b1=b1, b2=b2)


# ---------------------------------------------------------------------------
# Wrapper
# ---------------------------------------------------------------------------
def residual_block_apply(x_nchw, params):
    """x_nchw: (N, C, H, W) float32; params from make_resblock_params."""
    N, C, H, W = x_nchw.shape
    assert H % 2 == 0, "H must be even for the 2-rows-per-lane-slab packing"
    rows_per_sample = H // 2
    L = 2 * W * C                         # lane width (128 at the test shape)
    R = N * rows_per_sample               # total packed rows

    # NCHW -> (N*H/2, 2*W*C): two image rows folded into the lane dim.
    x = jnp.transpose(x_nchw, (0, 2, 3, 1)).astype(jnp.float32)
    x = x.reshape(N, rows_per_sample, L).reshape(R, L)

    # Coarse grid: each block covers whole samples (so roll+mask stays sample-local)
    # and is as large as reasonable to amortize per-step overhead.
    samples_per_block = min(N, max(1, 512 // rows_per_sample))
    while N % samples_per_block:
        samples_per_block -= 1
    block_rows = samples_per_block * rows_per_sample
    if samples_per_block < N and block_rows % 8 != 0:
        samples_per_block, block_rows = N, R      # fall back to a single block
    num_blocks = N // samples_per_block

    out = pl.pallas_call(
        functools.partial(_resblock_kernel, rows_per_sample=rows_per_sample),
        out_shape=jax.ShapeDtypeStruct((R, L), jnp.float32),
        grid=(num_blocks,),
        in_specs=[
            pl.BlockSpec((block_rows, L), lambda i: (i, 0)),   # activations
            pl.BlockSpec((3 * L, L), lambda i: (0, 0)),        # conv1 bands (resident, bf16)
            pl.BlockSpec((3 * L, L), lambda i: (0, 0)),        # conv2 bands (resident, bf16)
            pl.BlockSpec((1, L), lambda i: (0, 0)),            # bias1
            pl.BlockSpec((1, L), lambda i: (0, 0)),            # bias2
        ],
        out_specs=pl.BlockSpec((block_rows, L), lambda i: (i, 0)),
        compiler_params=pltpu.CompilerParams(
            dimension_semantics=("parallel",)),                # independent row blocks
    )(x, params["w1"], params["w2"], params["b1"], params["b2"])

    # (N*H/2, 2*W*C) -> NCHW
    out = out.reshape(N, rows_per_sample, 2, W, C).reshape(N, H, W, C)
    return jnp.transpose(out, (0, 3, 1, 2))


# ---------------------------------------------------------------------------
# Reference (pure JAX, f32)
# ---------------------------------------------------------------------------
def _reference(x_nchw, w1, w2, g1, be1, rm1, rv1, g2, be2, rm2, rv2):
    def conv(x, w):
        return jax.lax.conv_general_dilated(
            x, w, window_strides=(1, 1), padding="SAME",
            dimension_numbers=("NCHW", "OIHW", "NCHW"))

    def bn(x, g, be, rm, rv):
        s = g / jnp.sqrt(rv + BN_EPS)
        b = be - rm * s
        return x * s[None, :, None, None] + b[None, :, None, None]

    h = conv(x_nchw, w1)
    h = bn(h, g1, be1, rm1, rv1)
    h = jnp.where(h >= 0, h, NEG_SLOPE * h)
    h = conv(h, w2)
    h = bn(h, g2, be2, rm2, rv2)
    h = jnp.where(h >= 0, h, NEG_SLOPE * h)
    return h + x_nchw


if __name__ == "__main__":
    key = jax.random.PRNGKey(0)
    kx, kw1, kw2, kg1, kb1, kg2, kb2 = jax.random.split(key, 7)

    N, C, H, W = 2, 4, 16, 16
    x = jax.random.normal(kx, (N, C, H, W), jnp.float32)

    # Conv2d weights, OIHW, Kaiming-like deterministic init (no bias, as in module)
    fan_in = C * 3 * 3
    w1 = jax.random.normal(kw1, (C, C, 3, 3), jnp.float32) / np.sqrt(fan_in)
    w2 = jax.random.normal(kw2, (C, C, 3, 3), jnp.float32) / np.sqrt(fan_in)

    # BatchNorm parameters (eval mode, slightly perturbed from fresh init)
    g1 = 1.0 + 0.1 * jax.random.normal(kg1, (C,), jnp.float32)
    be1 = 0.1 * jax.random.normal(kb1, (C,), jnp.float32)
    rm1 = jnp.zeros((C,), jnp.float32)
    rv1 = jnp.ones((C,), jnp.float32)
    g2 = 1.0 + 0.1 * jax.random.normal(kg2, (C,), jnp.float32)
    be2 = 0.1 * jax.random.normal(kb2, (C,), jnp.float32)
    rm2 = jnp.zeros((C,), jnp.float32)
    rv2 = jnp.ones((C,), jnp.float32)

    # One-time parameter packing (hoisted out of the per-call path).
    params = make_resblock_params(w1, w2, g1, be1, rm1, rv1, g2, be2, rm2, rv2, W=W)
    params = jax.tree_util.tree_map(jax.block_until_ready, params)

    apply_fn = jax.jit(residual_block_apply)
    out = jax.block_until_ready(apply_fn(x, params))

    ref = _reference(x, w1, w2, g1, be1, rm1, rv1, g2, be2, rm2, rv2)
    # bf16 MXU operands -> loosened tolerance vs the f32 reference.
    np.testing.assert_allclose(np.asarray(out), np.asarray(ref), rtol=5e-2, atol=5e-2)

    print("KERNEL_OK")
</pallas_src>

<mosaic_0001>
module attributes {stable_mosaic.version = 11 : i64} {
  func.func @_resblock_kernel(%arg0: i32, %arg1: memref<16x128xf32, #tpu.memory_space<vmem>>, %arg2: memref<384x128xbf16, #tpu.memory_space<vmem>>, %arg3: memref<384x128xbf16, #tpu.memory_space<vmem>>, %arg4: memref<1x128xf32, #tpu.memory_space<vmem>>, %arg5: memref<1x128xf32, #tpu.memory_space<vmem>>, %arg6: memref<16x128xf32, #tpu.memory_space<vmem>>) attributes {dimension_semantics = [#tpu.dimension_semantics<parallel>], iteration_bounds = array<i64: 1>, scalar_prefetch = 0 : i64, scratch_operands = 0 : i64, tpu.core_type = #tpu.core_type<tc>, window_params = [{transform_indices = @transform_0, window_bounds = array<i64: 16, 128>}, {pipeline_mode = #tpu.pipeline_mode<synchronous>, transform_indices = @transform_1, window_bounds = array<i64: 384, 128>}, {pipeline_mode = #tpu.pipeline_mode<synchronous>, transform_indices = @transform_2, window_bounds = array<i64: 384, 128>}, {pipeline_mode = #tpu.pipeline_mode<synchronous>, transform_indices = @transform_3, window_bounds = array<i64: 1, 128>}, {pipeline_mode = #tpu.pipeline_mode<synchronous>, transform_indices = @transform_4, window_bounds = array<i64: 1, 128>}, {transform_indices = @transform_5, window_bounds = array<i64: 16, 128>}]} {
    %c0 = arith.constant 0 : index
    %c0_0 = arith.constant 0 : index
    %0 = vector.load %arg1[%c0, %c0_0] : memref<16x128xf32, #tpu.memory_space<vmem>>, vector<16x128xf32>
    %1 = tpu.iota {dimensions = array<i32: 0>} : vector<16x128xi32>
    %c8_i32 = arith.constant 8 : i32
    %c0_i32 = arith.constant 0 : i32
    %2 = arith.cmpi eq, %c8_i32, %c0_i32 : i32
    %c1_i32 = arith.constant 1 : i32
    %3 = arith.select %2, %c1_i32, %c8_i32 : i32
    %4 = vector.broadcast %3 : i32 to vector<16x128xi32>
    %5 = arith.remsi %1, %4 : vector<16x128xi32>
    %c0_i32_1 = arith.constant 0 : i32
    %6 = vector.broadcast %c0_i32_1 : i32 to vector<16x128xi32>
    %7 = arith.cmpi ne, %5, %6 : vector<16x128xi32>
    %c0_i32_2 = arith.constant 0 : i32
    %8 = vector.broadcast %c0_i32_2 : i32 to vector<16x128xi32>
    %9 = arith.cmpi slt, %5, %8 : vector<16x128xi32>
    %c0_i32_3 = arith.constant 0 : i32
    %10 = arith.cmpi slt, %3, %c0_i32_3 : i32
    %11 = vector.broadcast %10 : i1 to vector<16x128xi1>
    %12 = vector.broadcast %11 : vector<16x128xi1> to vector<16x128xi1>
    %13 = arith.xori %9, %12 : vector<16x128xi1>
    %14 = arith.andi %13, %7 : vector<16x128xi1>
    %15 = vector.broadcast %3 : i32 to vector<16x128xi32>
    %16 = arith.addi %5, %15 : vector<16x128xi32>
    %17 = arith.select %14, %16, %5 : vector<16x128xi1>, vector<16x128xi32>
    %c0_i32_4 = arith.constant 0 : i32
    %18 = vector.broadcast %c0_i32_4 : i32 to vector<16x128xi32>
    %19 = arith.cmpi eq, %17, %18 : vector<16x128xi32>
    %c8_i32_5 = arith.constant 8 : i32
    %c0_i32_6 = arith.constant 0 : i32
    %20 = arith.cmpi eq, %c8_i32_5, %c0_i32_6 : i32
    %c1_i32_7 = arith.constant 1 : i32
    %21 = arith.select %20, %c1_i32_7, %c8_i32_5 : i32
    %22 = vector.broadcast %21 : i32 to vector<16x128xi32>
    %23 = arith.remsi %1, %22 : vector<16x128xi32>
    %c0_i32_8 = arith.constant 0 : i32
    %24 = vector.broadcast %c0_i32_8 : i32 to vector<16x128xi32>
    %25 = arith.cmpi ne, %23, %24 : vector<16x128xi32>
    %c0_i32_9 = arith.constant 0 : i32
    %26 = vector.broadcast %c0_i32_9 : i32 to vector<16x128xi32>
    %27 = arith.cmpi slt, %23, %26 : vector<16x128xi32>
    %c0_i32_10 = arith.constant 0 : i32
    %28 = arith.cmpi slt, %21, %c0_i32_10 : i32
    %29 = vector.broadcast %28 : i1 to vector<16x128xi1>
    %30 = vector.broadcast %29 : vector<16x128xi1> to vector<16x128xi1>
    %31 = arith.xori %27, %30 : vector<16x128xi1>
    %32 = arith.andi %31, %25 : vector<16x128xi1>
    %33 = vector.broadcast %21 : i32 to vector<16x128xi32>
    %34 = arith.addi %23, %33 : vector<16x128xi32>
    %35 = arith.select %32, %34, %23 : vector<16x128xi1>, vector<16x128xi32>
    %c7_i32 = arith.constant 7 : i32
    %36 = vector.broadcast %c7_i32 : i32 to vector<16x128xi32>
    %37 = arith.cmpi eq, %35, %36 : vector<16x128xi32>
    %c1_i32_11 = arith.constant 1 : i32
    %38 = tpu.dynamic_rotate %0 by %c1_i32_11 dim 0 : vector<16x128xf32>, i32 -> vector<16x128xf32>
    %cst = arith.constant 0.000000e+00 : f32
    %39 = vector.broadcast %cst : f32 to vector<16x128xf32>
    %40 = arith.select %19, %39, %38 : vector<16x128xi1>, vector<16x128xf32>
    %c15_i32 = arith.constant 15 : i32
    %41 = tpu.dynamic_rotate %0 by %c15_i32 dim 0 : vector<16x128xf32>, i32 -> vector<16x128xf32>
    %cst_12 = arith.constant 0.000000e+00 : f32
    %42 = vector.broadcast %cst_12 : f32 to vector<16x128xf32>
    %43 = arith.select %37, %42, %41 : vector<16x128xi1>, vector<16x128xf32>
    %44 = tpu.concatenate %40, %0, %43 in 1 : vector<16x128xf32>, vector<16x128xf32>, vector<16x128xf32> -> vector<16x384xf32>
    %45 = arith.truncf %44 : vector<16x384xf32> to vector<16x384xbf16>
    %c0_13 = arith.constant 0 : index
    %c0_14 = arith.constant 0 : index
    %46 = vector.load %arg2[%c0_13, %c0_14] : memref<384x128xbf16, #tpu.memory_space<vmem>>, vector<384x128xbf16>
    %cst_15 = arith.constant dense<0.000000e+00> : vector<16x128xf32>
    %47 = tpu.matmul %45, %46, %cst_15 {dimension_numbers = #tpu.dot_dimension_numbers<[1], [0], [0], [1], [0, 0, 1, 1], [], []>} : vector<16x384xbf16>, vector<384x128xbf16>, vector<16x128xf32> -> vector<16x128xf32>
    %c0_16 = arith.constant 0 : index
    %c0_17 = arith.constant 0 : index
    %48 = vector.load %arg4[%c0_16, %c0_17] : memref<1x128xf32, #tpu.memory_space<vmem>>, vector<1x128xf32>
    %49 = vector.broadcast %48 : vector<1x128xf32> to vector<16x128xf32>
    %50 = arith.addf %47, %49 : vector<16x128xf32>
    %cst_18 = arith.constant 0.000000e+00 : f32
    %51 = vector.broadcast %cst_18 : f32 to vector<16x128xf32>
    %52 = arith.cmpf oge, %50, %51 : vector<16x128xf32>
    %cst_19 = arith.constant 0.00999999977 : f32
    %53 = vector.broadcast %cst_19 : f32 to vector<16x128xf32>
    %54 = arith.mulf %53, %50 : vector<16x128xf32>
    %55 = arith.select %52, %50, %54 : vector<16x128xi1>, vector<16x128xf32>
    %c1_i32_20 = arith.constant 1 : i32
    %56 = tpu.dynamic_rotate %55 by %c1_i32_20 dim 0 : vector<16x128xf32>, i32 -> vector<16x128xf32>
    %cst_21 = arith.constant 0.000000e+00 : f32
    %57 = vector.broadcast %cst_21 : f32 to vector<16x128xf32>
    %58 = arith.select %19, %57, %56 : vector<16x128xi1>, vector<16x128xf32>
    %c15_i32_22 = arith.constant 15 : i32
    %59 = tpu.dynamic_rotate %55 by %c15_i32_22 dim 0 : vector<16x128xf32>, i32 -> vector<16x128xf32>
    %cst_23 = arith.constant 0.000000e+00 : f32
    %60 = vector.broadcast %cst_23 : f32 to vector<16x128xf32>
    %61 = arith.select %37, %60, %59 : vector<16x128xi1>, vector<16x128xf32>
    %62 = tpu.concatenate %58, %55, %61 in 1 : vector<16x128xf32>, vector<16x128xf32>, vector<16x128xf32> -> vector<16x384xf32>
    %63 = arith.truncf %62 : vector<16x384xf32> to vector<16x384xbf16>
    %c0_24 = arith.constant 0 : index
    %c0_25 = arith.constant 0 : index
    %64 = vector.load %arg3[%c0_24, %c0_25] : memref<384x128xbf16, #tpu.memory_space<vmem>>, vector<384x128xbf16>
    %cst_26 = arith.constant dense<0.000000e+00> : vector<16x128xf32>
    %65 = tpu.matmul %63, %64, %cst_26 {dimension_numbers = #tpu.dot_dimension_numbers<[1], [0], [0], [1], [0, 0, 1, 1], [], []>} : vector<16x384xbf16>, vector<384x128xbf16>, vector<16x128xf32> -> vector<16x128xf32>
    %c0_27 = arith.constant 0 : index
    %c0_28 = arith.constant 0 : index
    %66 = vector.load %arg5[%c0_27, %c0_28] : memref<1x128xf32, #tpu.memory_space<vmem>>, vector<1x128xf32>
    %67 = vector.broadcast %66 : vector<1x128xf32> to vector<16x128xf32>
    %68 = arith.addf %65, %67 : vector<16x128xf32>
    %cst_29 = arith.constant 0.000000e+00 : f32
    %69 = vector.broadcast %cst_29 : f32 to vector<16x128xf32>
    %70 = arith.cmpf oge, %68, %69 : vector<16x128xf32>
    %cst_30 = arith.constant 0.00999999977 : f32
    %71 = vector.broadcast %cst_30 : f32 to vector<16x128xf32>
    %72 = arith.mulf %71, %68 : vector<16x128xf32>
    %73 = arith.select %70, %68, %72 : vector<16x128xi1>, vector<16x128xf32>
    %74 = arith.addf %73, %0 : vector<16x128xf32>
    %c0_31 = arith.constant 0 : index
    %c0_32 = arith.constant 0 : index
    %75 = vector.load %arg6[%c0_31, %c0_32] : memref<16x128xf32, #tpu.memory_space<vmem>>, vector<16x128xf32>
    tpu.vector_store %arg6[%c0_31, %c0_32], %74 {strides = array<i32>} : memref<16x128xf32, #tpu.memory_space<vmem>>, vector<16x128xf32>,
    return
  }
  func.func @transform_0(%arg0: i32) -> (i32, i32) {
    %c0_i32 = arith.constant 0 : i32
    %c0_i32_0 = arith.constant 0 : i32
    return %arg0, %c0_i32 : i32, i32
  }
  func.func @transform_1(%arg0: i32) -> (i32, i32) {
    %c0_i32 = arith.constant 0 : i32
    %c0_i32_0 = arith.constant 0 : i32
    %c0_i32_1 = arith.constant 0 : i32
    return %c0_i32, %c0_i32_0 : i32, i32
  }
  func.func @transform_2(%arg0: i32) -> (i32, i32) {
    %c0_i32 = arith.constant 0 : i32
    %c0_i32_0 = arith.constant 0 : i32
    %c0_i32_1 = arith.constant 0 : i32
    return %c0_i32, %c0_i32_0 : i32, i32
  }
  func.func @transform_3(%arg0: i32) -> (i32, i32) {
    %c0_i32 = arith.constant 0 : i32
    %c0_i32_0 = arith.constant 0 : i32
    %c0_i32_1 = arith.constant 0 : i32
    return %c0_i32, %c0_i32_0 : i32, i32
  }
  func.func @transform_4(%arg0: i32) -> (i32, i32) {
    %c0_i32 = arith.constant 0 : i32
    %c0_i32_0 = arith.constant 0 : i32
    %c0_i32_1 = arith.constant 0 : i32
    return %c0_i32, %c0_i32_0 : i32, i32
  }
  func.func @transform_5(%arg0: i32) -> (i32, i32) {
    %c0_i32 = arith.constant 0 : i32
    %c0_i32_0 = arith.constant 0 : i32
    return %arg0, %c0_i32 : i32, i32
  }
}

</mosaic_0001>

<bundles_post_ra>
// kernel: residual_block_apply.1
= control target key start
LH: loop header
LB: loop body
LE: loop exit
PB: predicated region body
PF: predicated region fallthrough
CT: control target
= control target key end

     0   :  { %v894_v1 = vmov 0.0   ;;  %vm895_vm0 = vmmov 0   ;;  %v23_v9 = vlaneseq  ;;  %s1186_s1 = inlined_call_operand.vmem [shape: bf16[384,128], index: 1, kind: input, shape index: {}]   ;;  %s1187_s0 = inlined_call_operand.vmem [shape: f32[16,128], index: 0, kind: input, shape index: {}]   ;;  %s1188_s2 = inlined_call_operand.vmem [shape: bf16[384,128], index: 2, kind: input, shape index: {}]   ;;  %s1189_s3 = inlined_call_operand.vmem [shape: f32[1,128], index: 3, kind: input, shape index: {}]   ;;  %s1190_s4 = inlined_call_operand.vmem [shape: f32[1,128], index: 4, kind: input, shape index: {}]   ;;  %s1191_s5 = inlined_call_operand.vmem [shape: f32[16,128], index: 5, kind: output, shape index: {}]  }
   0x1   :  { %v846_v0 = vld [vmem:[%s1186_s1 + $0x40] sm:$0xff]   ;;  %804 = vmatprep.subr.bf16.mxu1 %v894_v1  ;;  %820 = vmatprep.mubr.msk.bf16.mxu1 %vm895_vm0, %v894_v1  ;;  %v849_v4 = vld [vmem:[%s1186_s1 + $0x48] sm:$0xff]   ;;  %v852_v7 = vld [vmem:[%s1186_s1 + $0x50] sm:$0xff]  }
   0x2   :  { %v847_v2 = vld [vmem:[%s1186_s1] sm:$0xff]   ;;  %742 = vmatprep.subr.bf16.mxu0 %v846_v0  ;;  %v850_v5 = vld [vmem:[%s1186_s1 + $0x8] sm:$0xff]   ;;  %v853_v8 = vld [vmem:[%s1186_s1 + $0x10] sm:$0xff]   ;;  %v967_v14 = vshrl.u32 %v23_v9, 7 }
   0x3   :  { %v848_v3 = vld [vmem:[%s1186_s1 + $0x80] sm:$0xff]   ;;  %743 = vmatpush3.bf16.msra.mxu0 %v847_v2  ;;  %v851_v6 = vld [vmem:[%s1186_s1 + $0x88] sm:$0xff]   ;;  %v854_v10 = vld [vmem:[%s1186_s1 + $0x90] sm:$0xff]  }
   0x4   :  { %805 = vmatpush3.bf16.msra.mxu1 %v848_v3  ;;  %744 = vmatprep.subr.bf16.mxu0 %v849_v4  ;;  %v855_v11 = vld [vmem:[%s1186_s1 + $0x58] sm:$0xff]   ;;  %v858_v15 = vld [vmem:[%s1186_s1 + $0x60] sm:$0xff]   ;;  %v25_v18 = vadd.s32 8, %v967_v14  ;;  %v861_v19 = vld [vmem:[%s1186_s1 + $0x68] sm:$0xff]   ;;  %v30_v21 = vand.u32 7, %v967_v14  ;;  %vm56_vm1 = vcmp.lt.s32.totalorder %v967_v14, 1 }
   0x5   :  { %806 = vmatprep.subr.bf16.mxu1 %v894_v1  ;;  %v856_v12 = vld [vmem:[%s1186_s1 + $0x18] sm:$0xff]   ;;  %v859_v16 = vld [vmem:[%s1186_s1 + $0x20] sm:$0xff]   ;;  %v862_v20 = vld [vmem:[%s1186_s1 + $0x28] sm:$0xff]   ;;  %vm63_vm4 = vcmp.lt.s32.totalorder %v967_v14, 7 }
   0x6   :  { %v857_v13 = vld [vmem:[%s1186_s1 + $0x98] sm:$0xff]   ;;  %v860_v17 = vld [vmem:[%s1186_s1 + $0xa0] sm:$0xff]   ;;  %v863_v22 = vld [vmem:[%s1186_s1 + $0xa8] sm:$0xff]   ;;  %v37_v23 = vand.u32 7, %v25_v18  ;;  %vm1019_vm3 = vcmp.ne.s32.totalorder %v30_v21, 0  ;;  %vm1042_vm7 = vcmp.ne.s32.totalorder %v30_v21, 7 }
   0x7   :  { %745 = vmatpush3.bf16.msra.mxu0 %v850_v5  ;;  %v864_v24 = vld [vmem:[%s1186_s1 + $0x70] sm:$0xff]   ;;  %v867_v27 = vld [vmem:[%s1186_s1 + $0x78] sm:$0xff]   ;;  %v1008_v28 = vld [vmem:[%s1187_s0] sm:$0xff] }
   0x8   :  { %807 = vmatpush3.bf16.msra.mxu1 %v851_v6  ;;  %746 = vmatprep.subr.bf16.mxu0 %v852_v7  ;;  %v865_v25 = vld [vmem:[%s1186_s1 + $0x30] sm:$0xff]   ;;  %v1013_v29 = vld [vmem:[%s1187_s0 + $0x8] sm:$0xff]  ;;  %vm1015_vm2 = vcmp.ne.s32.totalorder %v37_v23, 0  ;;  %v54_v32 = vrot.slane %v1008_v28, 7  ;;  %v61_v34 = vrot.slane %v1008_v28, 1  ;;  %v868_v36 = vld [vmem:[%s1186_s1 + $0x38] sm:$0xff]  }
   0x9   :  { %808 = vmatprep.subr.bf16.mxu1 %v894_v1  ;;  %v866_v26 = vld [vmem:[%s1186_s1 + $0xb0] sm:$0xff]   ;;  %v55_v33 = vrot.slane %v1013_v29, 7  ;;  %v62_v35 = vrot.slane %v1013_v29, 1  ;;  %v69_v37 = vpack.c.bf16 %v1013_v29, %v1008_v28  ;;  %vm695_vm5 = vmpackc.low %vm1015_vm2, %vm1019_vm3  ;;  %vm1038_vm6 = vcmp.ne.s32.totalorder %v37_v23, 7  ;;  %v869_v40 = vld [vmem:[%s1186_s1 + $0xb8] sm:$0xff]  }
   0xa   :  { %v870_v45 = vld [vmem:[%s1188_s2 + $0x40] sm:$0xff]   ;;  %vm700_vm8 = vmpackc.low %vm1038_vm6, %vm1042_vm7  ;;  %v873_v50 = vld [vmem:[%s1188_s2 + $0x48] sm:$0xff]  }
   0xb   :  { %747 = vmatpush3.bf16.msra.mxu0 %v853_v8  ;;  %302 = vmatprep.mubr.bf16.mxu0 %v69_v37  ;;  %v57_v41 = vsel %vm56_vm1, %v54_v32, %v55_v33  ;;  %v58_v42 = vsel %vm56_vm1, %v55_v33, %v54_v32  ;;  %v64_v43 = vsel %vm63_vm4, %v61_v34, %v62_v35  ;;  %v871_v47 = vld [vmem:[%s1188_s2] sm:$0xff]   ;;  %v874_v51 = vld [vmem:[%s1188_s2 + $0x8] sm:$0xff]   ;;  %v876_v53 = vld [vmem:[%s1188_s2 + $0x50] sm:$0xff]  }
   0xc   :  { %809 = vmatpush3.bf16.msra.mxu1 %v854_v10  ;;  %748 = vmatprep.subr.bf16.mxu0 %v855_v11  ;;  %v65_v44 = vsel %vm63_vm4, %v62_v35, %v61_v34  ;;  %v696_v46 = vpack.c.bf16 %v57_v41, %v58_v42  ;;  %v872_v49 = vld [vmem:[%s1188_s2 + $0x80] sm:$0xff]   ;;  %v875_v52 = vld [vmem:[%s1188_s2 + $0x88] sm:$0xff]   ;;  %v877_v54 = vld [vmem:[%s1188_s2 + $0x10] sm:$0xff]  }
   0xd   :  { %810 = vmatprep.subr.bf16.mxu1 %v894_v1  ;;  %v701_v48 = vpack.c.bf16 %v65_v44, %v64_v43  ;;  %v878_v55 = vld [vmem:[%s1188_s2 + $0x90] sm:$0xff]   ;;  %v879_v56 = vld [vmem:[%s1188_s2 + $0x58] sm:$0xff]   ;;  %v882_v59 = vld [vmem:[%s1188_s2 + $0x60] sm:$0xff]  }
   0xe   :  { %v880_v57 = vld [vmem:[%s1188_s2 + $0x18] sm:$0xff]   ;;  %v883_v60 = vld [vmem:[%s1188_s2 + $0x20] sm:$0xff]   ;;  %v885_v62 = vld [vmem:[%s1188_s2 + $0x68] sm:$0xff]  }
   0xf   :  { %749 = vmatpush3.bf16.msra.mxu0 %v856_v12  ;;  %v881_v58 = vld [vmem:[%s1188_s2 + $0x98] sm:$0xff]   ;;  %v884_v61 = vld [vmem:[%s1188_s2 + $0xa0] sm:$0xff]   ;;  %v886_v63 = vld [vmem:[%s1188_s2 + $0x28] sm:$0xff]  }
  0x10   :  { %811 = vmatpush3.bf16.msra.mxu1 %v857_v13  ;;  %750 = vmatprep.subr.bf16.mxu0 %v858_v15  ;;  %v887_v0 = vld [vmem:[%s1188_s2 + $0xa8] sm:$0xff]   ;;  %v888_v2 = vld [vmem:[%s1188_s2 + $0x70] sm:$0xff]   ;;  %v891_v5 = vld [vmem:[%s1188_s2 + $0x78] sm:$0xff]  }
  0x11   :  { %812 = vmatprep.subr.bf16.mxu1 %v894_v1  ;;  %v889_v3 = vld [vmem:[%s1188_s2 + $0x30] sm:$0xff]   ;;  %v892_v6 = vld [vmem:[%s1188_s2 + $0x38] sm:$0xff]   ;;  %v668_v10 = vld [vmem:[%s1189_s3] ss:$0 sm:$0xff] }
  0x12   :  { %v890_v4 = vld [vmem:[%s1188_s2 + $0xb0] sm:$0xff]   ;;  %v893_v7 = vld [vmem:[%s1188_s2 + $0xb8] sm:$0xff]   ;;  %v703_v14 = vld [vmem:[%s1190_s4] ss:$0 sm:$0xff] }
  0x13   :  { %751 = vmatpush3.bf16.msra.mxu0 %v859_v16 }
  0x14   :  { %813 = vmatpush3.bf16.msra.mxu1 %v860_v17  ;;  %752 = vmatprep.subr.bf16.mxu0 %v861_v19 }
  0x15   :  { %814 = vmatprep.subr.bf16.mxu1 %v894_v1 }
  0x17   :  { %753 = vmatpush3.bf16.msra.mxu0 %v862_v20 }
  0x18   :  { %815 = vmatpush3.bf16.msra.mxu1 %v863_v22  ;;  %754 = vmatprep.subr.bf16.mxu0 %v864_v24 }
  0x19   :  { %816 = vmatprep.subr.bf16.mxu1 %v894_v1 }
  0x1b   :  { %755 = vmatpush3.bf16.msra.mxu0 %v865_v25 }
  0x1c   :  { %817 = vmatpush3.bf16.msra.mxu1 %v866_v26  ;;  %756 = vmatprep.subr.bf16.mxu0 %v867_v27 }
  0x1d   :  { %818 = vmatprep.subr.bf16.mxu1 %v894_v1 }
  0x1f   :  { %757 = vmatpush3.bf16.msra.mxu0 %v868_v36 }
  0x20   :  { %819 = vmatpush3.bf16.msra.mxu1 %v869_v40  ;;  %773 = vmatprep.subr.bf16.mxu0 %v870_v45 }
  0x21   :  { %824 = vmatprep.subr.bf16.mxu1 %v894_v1 }
  0x22   :  { %697 = vmatmul.mubr.msk.bf16.vlgmr.msra.gmra.mrb[0].mxu0 %vm695_vm5, %v696_v46 }
  0x23   :  { %821 = vmatmul.mubr.msk.bf16.vlgmr.msra.gmra.mrb[0].mxu1 %vm700_vm8, %v701_v48  ;;  %774 = vmatpush3.bf16.msra.mxu0 %v871_v47 }
  0x24   :  { %825 = vmatpush3.bf16.msra.mxu1 %v872_v49  ;;  %775 = vmatprep.subr.bf16.mxu0 %v873_v50 }
  0x25   :  { %826 = vmatprep.subr.bf16.mxu1 %v894_v1  ;;  %840 = vmatprep.mubr.msk.bf16.mxu1 %vm895_vm0, %v894_v1 }
  0x27   :  { %776 = vmatpush3.bf16.msra.mxu0 %v874_v51 }
  0x28   :  { %827 = vmatpush3.bf16.msra.mxu1 %v875_v52  ;;  %777 = vmatprep.subr.bf16.mxu0 %v876_v53 }
  0x29   :  { %828 = vmatprep.subr.bf16.mxu1 %v894_v1 }
  0x2b   :  { %778 = vmatpush3.bf16.msra.mxu0 %v877_v54 }
  0x2c   :  { %829 = vmatpush3.bf16.msra.mxu1 %v878_v55  ;;  %779 = vmatprep.subr.bf16.mxu0 %v879_v56 }
  0x2d   :  { %830 = vmatprep.subr.bf16.mxu1 %v894_v1 }
  0x2f   :  { %780 = vmatpush3.bf16.msra.mxu0 %v880_v57 }
  0x30   :  { %831 = vmatpush3.bf16.msra.mxu1 %v881_v58  ;;  %781 = vmatprep.subr.bf16.mxu0 %v882_v59 }
  0x31   :  { %832 = vmatprep.subr.bf16.mxu1 %v894_v1 }
  0x33   :  { %782 = vmatpush3.bf16.msra.mxu0 %v883_v60 }
  0x34   :  { %833 = vmatpush3.bf16.msra.mxu1 %v884_v61  ;;  %783 = vmatprep.subr.bf16.mxu0 %v885_v62 }
  0x35   :  { %834 = vmatprep.subr.bf16.mxu1 %v894_v1 }
  0x37   :  { %784 = vmatpush3.bf16.msra.mxu0 %v886_v63 }
  0x38   :  { %835 = vmatpush3.bf16.msra.mxu1 %v887_v0  ;;  %785 = vmatprep.subr.bf16.mxu0 %v888_v2 }
  0x39   :  { %836 = vmatprep.subr.bf16.mxu1 %v894_v1 }
  0x3b   :  { %786 = vmatpush3.bf16.msra.mxu0 %v889_v3 }
  0x3c   :  { %837 = vmatpush3.bf16.msra.mxu1 %v890_v4  ;;  %787 = vmatprep.subr.bf16.mxu0 %v891_v5 }
  0x3d   :  { %838 = vmatprep.subr.bf16.mxu1 %v894_v1 }
  0x3f   :  { %788 = vmatpush3.bf16.msra.mxu0 %v892_v6 }
  0x40   :  { %839 = vmatpush3.bf16.msra.mxu1 %v893_v7 }
  0xf5   :  { %v758_v8 = vpop.f32.mrb[0].mxu0 }
  0xf6   :  { %v759_v9 = vpop.f32.mrb[1].mxu0  ;;  %v345_v11 = vpop.f32.mrb[0].mxu1 }
  0xf7   :  { %v760_v12 = vadd.f32 %v759_v9, %v758_v8  ;;  %v761_v1 = vpop.f32.mrb[2].mxu0  ;;  %v822_v13 = vpop.f32.mrb[1].mxu1 }
  0xf8   :  { %v762_v15 = vpop.f32.mrb[3].mxu0  ;;  %v348_v16 = vpop.f32.mrb[2].mxu1 }
  0xf9   :  { %v305_v17 = vadd.f32 %v760_v12, %v668_v10  ;;  %v763_v18 = vadd.f32 %v762_v15, %v761_v1  ;;  %v823_v19 = vpop.f32.mrb[3].mxu1 }
  0xfb   :  { %v346_v20 = vadd.f32 %v345_v11, %v305_v17  ;;  %v308_v21 = vadd.f32 %v763_v18, %v668_v10 }
  0xfd   :  { %vm352_vm9 = vcmp.ge.f32.partialorder %v346_v20, 0.0  ;;  %v354_v22 = vmul.f32 0.01, %v346_v20  ;;  %v349_v23 = vadd.f32 %v348_v16, %v308_v21 }
  0xff   :  { %v356_v24 = vsel %vm352_vm9, %v346_v20, %v354_v22  ;;  %vm353_vm10 = vcmp.ge.f32.partialorder %v349_v23, 0.0  ;;  %v355_v25 = vmul.f32 0.01, %v349_v23 }
 0x100   :  { %v358_v26 = vrot.slane %v356_v24, 7  ;;  %v364_v32 = vrot.slane %v356_v24, 1 }
 0x101   :  { %v357_v27 = vsel %vm353_vm10, %v349_v23, %v355_v25 }
 0x102   :  { %v359_v33 = vrot.slane %v357_v27, 7  ;;  %v365_v34 = vrot.slane %v357_v27, 1  ;;  %v371_v35 = vpack.c.bf16 %v357_v27, %v356_v24 }
 0x104   :  { %v360_v36 = vsel %vm56_vm1, %v358_v26, %v359_v33  ;;  %v361_v37 = vsel %vm56_vm1, %v359_v33, %v358_v26  ;;  %v366_v40 = vsel %vm63_vm4, %v364_v32, %v365_v34  ;;  %v367_v41 = vsel %vm63_vm4, %v365_v34, %v364_v32  ;;  %604 = vmatprep.mubr.bf16.mxu0 %v371_v35 }
 0x105   :  { %v731_v42 = vpack.c.bf16 %v360_v36, %v361_v37  ;;  %v736_v43 = vpack.c.bf16 %v367_v41, %v366_v40 }
 0x107   :  { %732 = vmatmul.mubr.msk.bf16.vlgmr.msra.gmra.mrb[4].mxu0 %vm695_vm5, %v731_v42  ;;  %841 = vmatmul.mubr.msk.bf16.vlgmr.msra.gmra.mrb[4].mxu1 %vm700_vm8, %v736_v43 }
 0x1da   :  { %v789_v44 = vpop.f32.mrb[4].mxu0  ;;  %v647_v45 = vpop.f32.mrb[4].mxu1 }
 0x1db   :  { %v790_v46 = vpop.f32.mrb[5].mxu0  ;;  %v842_v47 = vpop.f32.mrb[5].mxu1 }
 0x1dc   :  { %v791_v48 = vadd.f32 %v790_v46, %v789_v44  ;;  %v792_v30 = vpop.f32.mrb[6].mxu0  ;;  %v650_v49 = vpop.f32.mrb[6].mxu1 }
 0x1dd   :  { %v793_v31 = vpop.f32.mrb[7].mxu0  ;;  %v843_v50 = vpop.f32.mrb[7].mxu1 }
 0x1de   :  { %v607_v51 = vadd.f32 %v791_v48, %v703_v14  ;;  %v794_v52 = vadd.f32 %v793_v31, %v792_v30 }
 0x1e0   :  { %v648_v38 = vadd.f32 %v647_v45, %v607_v51  ;;  %v610_v53 = vadd.f32 %v794_v52, %v703_v14 }
 0x1e2   :  { %vm654_vm11 = vcmp.ge.f32.partialorder %v648_v38, 0.0  ;;  %v656_v39 = vmul.f32 0.01, %v648_v38  ;;  %v651_v54 = vadd.f32 %v650_v49, %v610_v53 }
 0x1e4   :  { %v658_v55 = vsel %vm654_vm11, %v648_v38, %v656_v39  ;;  %vm655_vm12 = vcmp.ge.f32.partialorder %v651_v54, 0.0  ;;  %v657_v56 = vmul.f32 0.01, %v651_v54 }
 0x1e5   :  { %v660_v57 = vadd.f32 %v658_v55, %v1008_v28 }
 0x1e6   :  { %v659_v58 = vsel %vm655_vm12, %v651_v54, %v657_v56 }
 0x1e7   :  { %662 = vst [vmem:[%s1191_s5] sm:$0xff] %v660_v57  ;;  %v661_v59 = vadd.f32 %v659_v58, %v1013_v29 }
 0x1e9   :  { %663 = vst [vmem:[%s1191_s5 + $0x8] sm:$0xff] %v661_v59 }

</bundles_post_ra>
